<compile_context>
chip_gen: v7x
topology: tpu7x:2x2x1
jax: 0.10.0
libtpu: 0.0.40
codegen_flags: <defaults>
</compile_context>

<pallas_src>
import math

import jax
import jax.numpy as jnp
from jax.experimental import pallas as pl
from jax.experimental.pallas import tpu as pltpu

_TILE_BYTES = 2 * 1024 * 1024   # per-buffer budget; 4 double-buffered bufs <= 8 MiB
_MAX_LANES = 2048               # lane extent of a tile (multiple of 128)


def _copy_kernel(x_ref, o_ref):
    # Identity copy of one tile; native dtype, no upcast.
    o_ref[...] = x_ref[...]


def _sublane_unit(itemsize):
    # Sub-32-bit dtypes pack along sublanes (one bf16 vreg is [16,128]).
    return {4: 8, 2: 16, 1: 32}.get(itemsize, 8)


def _materialize_copy(a2d):
    """Lane-dense, VMEM-budgeted identity copy of a 2-D array."""
    R, L = a2d.shape
    itemsize = jnp.dtype(a2d.dtype).itemsize
    unit = _sublane_unit(itemsize)

    # Lane tile: full extent when it fits, else a 128-multiple cap (the cdiv
    # grid masks the boundary block) -- never the whole of a huge dimension.
    tc = L if L <= _MAX_LANES else _MAX_LANES

    # Row tile: multiple of the dtype's sublane unit, capped by the per-buffer
    # VMEM byte budget; full extent if the array is short.
    budget = max(unit, (_TILE_BYTES // (tc * itemsize)) // unit * unit)
    tr = R if R <= budget else budget

    grid = (pl.cdiv(R, tr), pl.cdiv(L, tc))

    return pl.pallas_call(
        _copy_kernel,
        out_shape=jax.ShapeDtypeStruct((R, L), a2d.dtype),
        grid_spec=pl.GridSpec(
            grid=grid,
            in_specs=[pl.BlockSpec((tr, tc), lambda i, j: (i, j))],
            out_specs=pl.BlockSpec((tr, tc), lambda i, j: (i, j)),
        ),
        # Output aliases the (freshly created) input view: no extra HBM
        # allocation / peak-footprint for a pure identity copy.
        input_output_aliases={0: 0},
        cost_estimate=pl.CostEstimate(
            flops=0,
            transcendentals=0,
            bytes_accessed=2 * R * L * itemsize,
        ),
        compiler_params=pltpu.CompilerParams(
            # Shard only the leading (contiguous) axis across TensorCores on
            # v7x; neutral on single-TC v5e/v6e.
            dimension_semantics=("parallel", "arbitrary"),
        ),
    )(a2d)


def flatten_layer(x):
    """PyTorch FlattenLayer.forward: x.view(x.shape[0], -1)."""
    N = x.shape[0]
    D = int(math.prod(x.shape[1:])) if x.ndim > 1 else 1
    total = N * D
    x2 = x.reshape(N, D)  # the flatten itself (row-major, metadata-only)

    # Prefer tiling the flat element stream: each tile is one contiguous HBM
    # segment and the lane extent is exactly the block width (no masked
    # stores), independent of awkward N / D values.
    if total % 128 == 0:
        lc = min(_MAX_LANES, total)
        if total >= 8 * 128:
            lc = min(lc, total // 8)      # keep >= 8 rows for sublane-dense tiles
        lc = (lc // 128) * 128
        while total % lc != 0:
            lc -= 128
        view = x2.reshape(total // lc, lc)
    else:
        view = x2                         # fallback: tile the logical (N, D)

    out = _materialize_copy(view)
    return out.reshape(N, D)


if __name__ == "__main__":
    key = jax.random.PRNGKey(0)
    N, C, H, W = 2, 4, 16, 16
    x = jax.random.normal(key, (N, C, H, W), dtype=jnp.float32)

    # Reference: torch x.view(x.shape[0], -1) == row-major reshape to (N, C*H*W).
    ref = x.reshape(N, -1)

    y = flatten_layer(x)
    jax.block_until_ready(y)

    assert y.shape == (N, C * H * W), y.shape
    assert jnp.array_equal(y, ref)

    print("KERNEL_OK")
</pallas_src>

<mosaic_0001>
module attributes {stable_mosaic.version = 11 : i64} {
  func.func @_copy_kernel(%arg0: i32, %arg1: i32, %arg2: memref<8x256xf32, #tpu.memory_space<vmem>>, %arg3: memref<8x256xf32, #tpu.memory_space<vmem>>) attributes {dimension_semantics = [#tpu.dimension_semantics<parallel>, #tpu.dimension_semantics<arbitrary>], iteration_bounds = array<i64: 1, 1>, scalar_prefetch = 0 : i64, scratch_operands = 0 : i64, tpu.core_type = #tpu.core_type<tc>, window_params = [{transform_indices = @transform_0, window_bounds = array<i64: 8, 256>}, {transform_indices = @transform_1, window_bounds = array<i64: 8, 256>}]} {
    %c0 = arith.constant 0 : index
    %c0_0 = arith.constant 0 : index
    %0 = vector.load %arg2[%c0, %c0_0] : memref<8x256xf32, #tpu.memory_space<vmem>>, vector<8x256xf32>
    %c0_1 = arith.constant 0 : index
    %c0_2 = arith.constant 0 : index
    %1 = vector.load %arg3[%c0_1, %c0_2] : memref<8x256xf32, #tpu.memory_space<vmem>>, vector<8x256xf32>
    tpu.vector_store %arg3[%c0_1, %c0_2], %0 {strides = array<i32>} : memref<8x256xf32, #tpu.memory_space<vmem>>, vector<8x256xf32>,
    return
  }
  func.func @transform_0(%arg0: i32, %arg1: i32) -> (i32, i32) {
    %c0_i32 = arith.constant 0 : i32
    return %arg0, %arg1 : i32, i32
  }
  func.func @transform_1(%arg0: i32, %arg1: i32) -> (i32, i32) {
    %c0_i32 = arith.constant 0 : i32
    return %arg0, %arg1 : i32, i32
  }
}

</mosaic_0001>

<bundles_post_ra>
// kernel: tpu_custom_call.1
= control target key start
LH: loop header
LB: loop body
LE: loop exit
PB: predicated region body
PF: predicated region fallthrough
CT: control target
= control target key end

     0   :  { %6 = vsyncpa [#allocation3], 0  ;;  %s126_s0 = inlined_call_operand.hbm [shape: f32[8,256], index: 0, kind: input, shape index: {}, may-alias: {0,1}]   ;;  %s127_s1 = inlined_call_operand.hbm [shape: f32[8,256], index: 1, kind: output, shape index: {}, may-alias: {0,1}]  }
   0x1   :  { %7 = vsyncpa [#allocation4], 0  ;;  %s90_s6 = smov [#allocation2]   ;;  %s42_s10 = scalar_lea.hbm %s126_s0, 256 }
   0x2   :  { %s14_s7 = sshll.u32 %s90_s6, 4  ;;  %p43_p0 = scmp.ne.s32.totalorder %s126_s0, %s42_s10  ;;  %s15_s7 = int_to_ptr.vmem [resolvable:$true] %s14_s7 }
   0x3   :  { %p46_p1 = scmp.lt.u32.totalorder %s42_s10, %s126_s0 }
   0x5   :  { %p48_p2 = pnand %p46_p1, %p43_p0 }
   0x7   :  { %51 = shalt.err (!%p48_p2)
}
   0x8   :  { %s52_s15 = scalar_lea.vmem %s15_s7, 256  ;;  %p57_p4 = scmp.lt.s32.totalorder %s15_s7, %s15_s7 }
   0x9   :  { %p53_p3 = scmp.ne.s32.totalorder %s15_s7, %s52_s15  ;;  %p58_p5 = scmp.lt.s32.totalorder %s52_s15, %s52_s15 }
   0xb   :  { %p59_p6 = por %p58_p5, %p57_p4 }
   0xd   :  { %p60_p7 = pnand %p59_p6, %p53_p3 }
   0xf   :  { %63 = shalt.err (!%p60_p7)
}
  0x10   :  { %17 = dma.hbm_to_vmem [thread:$0]  %s126_s0, 256, %s15_s7, [#allocation3]  }
  0x11   :  { %86 = dma.done.wait [#allocation3], 256  }
  0x12   :  { %87 = vsyncadd [#allocation3], 4294967040  ;;  %s91_s18 = smov [#allocation5]   ;;  %v21_v0 = vld [vmem:[#allocation2] sm:$0xff]  ;;  %v22_v1 = vld [vmem:[#allocation2 + $0x8] sm:$0xff] }
  0x13   :  { %s31_s19 = sshll.u32 %s91_s18, 4  ;;  %23 = vst [vmem:[#allocation5] sm:$0xff] %v21_v0  ;;  %24 = vst [vmem:[#allocation5 + $0x8] sm:$0xff] %v22_v1  ;;  %s32_s19 = int_to_ptr.vmem [resolvable:$true] %s31_s19 }
  0x14   :  { %s64_s20 = scalar_lea.vmem %s32_s19, 256  ;;  %p69_p9 = scmp.lt.s32.totalorder %s32_s19, %s32_s19 }
  0x15   :  { %p65_p8 = scmp.ne.s32.totalorder %s32_s19, %s64_s20  ;;  %p70_p10 = scmp.lt.s32.totalorder %s64_s20, %s64_s20 }
  0x17   :  { %p71_p11 = por %p70_p10, %p69_p9 }
  0x19   :  { %p72_p12 = pnand %p71_p11, %p65_p8 }
  0x1b   :  { %75 = shalt.err (!%p72_p12)
}
  0x1c   :  { %s76_s0 = scalar_lea.hbm %s127_s1, 256 }
  0x1d   :  { %p77_p13 = scmp.ne.s32.totalorder %s127_s1, %s76_s0  ;;  %p80_p0 = scmp.lt.u32.totalorder %s76_s0, %s127_s1 }
  0x1f   :  { %p82_p1 = pnand %p80_p0, %p77_p13 }
  0x21   :  { %85 = shalt.err (!%p82_p1)
}
  0x22   :  { %34 = dma.vmem_to_hbm [thread:$0]  %s32_s19, 256, %s127_s1, [#allocation4]  }
  0x23   :  { %88 = dma.done.wait [#allocation4], 256  }
  0x24   :  { %89 = vsyncadd [#allocation4], 4294967040 }
  0x25   :  { %38 = vsyncpa [#allocation3], 1 }
  0x26   :  { %39 = vsyncpa [#allocation4], 1 }

</bundles_post_ra>
